<compile_context>
chip_gen: v5e
topology: v5e:2x2
jax: 0.10.0
libtpu: 0.0.40
codegen_flags: <defaults>
</compile_context>

<pallas_src>
import jax
import jax.numpy as jnp
from jax.experimental import pallas as pl
from jax.experimental.pallas import tpu as pltpu


# -----------------------------------------------------------------------------
# Fused workflow kernel
# -----------------------------------------------------------------------------
def _workflow_kernel(x_ref, wt_ref, b_ref, y32_ref, y16_ref, diff_ref):
    """One grid step = one (batch, HW-tile) block.

    Computes the fp32 engine pass and the bf16 ('fp16') engine pass of the
    synthetic model  y = relu(W^T @ x + b)  from a single read of x, and
    accumulates max|y32 - y16| (the cross-engine check) into diff_ref.
    """
    hw_step = pl.program_id(1)

    x = x_ref[0]          # (C, Thw)  float32  -- H*W on the lane axis
    wt = wt_ref[...]      # (COUT, C) float32
    b = b_ref[...]        # (COUT, 1) float32

    # --- fp32 engine path: f32 matmul on the MXU -----------------------------
    acc32 = jnp.dot(wt, x, preferred_element_type=jnp.float32)
    y32 = jnp.maximum(acc32 + b, 0.0)
    y32_ref[0] = y32

    # --- "fp16" engine path: genuine bf16 multiplies, f32 accumulate --------
    acc16 = jnp.dot(wt.astype(jnp.bfloat16), x.astype(jnp.bfloat16),
                    preferred_element_type=jnp.float32)
    y16_bf16 = jnp.maximum(acc16 + b, 0.0).astype(jnp.bfloat16)
    # Store the engine output at its native reduced precision (half the HBM
    # write bytes of an f32 store).
    y16_ref[0] = y16_bf16

    # --- fused check: running max|y32 - y16| over the HW grid axis ----------
    @pl.when(hw_step == 0)
    def _():
        diff_ref[...] = jnp.zeros_like(diff_ref)

    d = jnp.max(jnp.abs(y32 - y16_bf16.astype(jnp.float32)))
    diff_ref[...] = jnp.maximum(diff_ref[...], d)


# -----------------------------------------------------------------------------
# Wrapper
# -----------------------------------------------------------------------------
def _pick_hw_tile(hw, cap=8192):
    """Largest legal lane-axis tile: full HW when small or not 128-aligned,
    otherwise the biggest multiple of 128 that divides HW and is <= cap."""
    if hw % 128 != 0 or hw <= cap:
        return hw
    t = cap
    while hw % t != 0:
        t -= 128
    return t


def run_workflow_fused(x_nchw, w, b, *, hw_tile=None):
    """Pallas analogue of infer_on_engine(fp32) + infer_on_engine(fp16) +
    check_inference_result, fused into a single pallas_call."""
    n, c, h, wdim = x_nchw.shape
    hw = h * wdim
    cout = w.shape[1]

    # NCHW -> (N, C, H*W): pure reshape, no transpose / extra XLA pass.
    x3 = x_nchw.reshape(n, c, hw).astype(jnp.float32)
    wt = jnp.transpose(w).astype(jnp.float32)       # (COUT, C)  (tiny, one-off)
    b2 = jnp.reshape(b, (cout, 1)).astype(jnp.float32)

    thw = _pick_hw_tile(hw) if hw_tile is None else hw_tile
    assert hw % thw == 0, "hw tile must divide H*W"
    grid = (n, hw // thw)  # batch axis parallel (feeds both v7x TensorCores)

    # Explicit VMEM budget so the same kernel is safe on v7x (64 MiB physical /
    # 32 MiB scoped default): double-buffered x block + f32 + bf16 output
    # blocks + small constants, with generous headroom, capped at 32 MiB.
    block_bytes = (4 * c * thw            # x tile (f32)
                   + 4 * cout * thw       # y32 tile (f32)
                   + 2 * cout * thw       # y16 tile (bf16)
                   + 4 * (cout * c + cout) + 4 * 8 * 128)
    vmem_limit = int(min(32 * 1024 * 1024,
                         max(16 * 1024 * 1024, 8 * block_bytes)))

    y32, y16, diff_part = pl.pallas_call(
        _workflow_kernel,
        out_shape=(
            jax.ShapeDtypeStruct((n, cout, hw), jnp.float32),    # fp32 engine
            jax.ShapeDtypeStruct((n, cout, hw), jnp.bfloat16),   # "fp16" engine
            jax.ShapeDtypeStruct((n, 8, 128), jnp.float32),      # per-batch |diff| partials
        ),
        grid_spec=pltpu.PrefetchScalarGridSpec(
            num_scalar_prefetch=0,
            grid=grid,
            in_specs=[
                pl.BlockSpec((1, c, thw), lambda i, j: (i, 0, j)),
                pl.BlockSpec((cout, c), lambda i, j: (0, 0)),
                pl.BlockSpec((cout, 1), lambda i, j: (0, 0)),
            ],
            out_specs=[
                pl.BlockSpec((1, cout, thw), lambda i, j: (i, 0, j)),
                pl.BlockSpec((1, cout, thw), lambda i, j: (i, 0, j)),
                pl.BlockSpec((1, 8, 128), lambda i, j: (i, 0, 0)),
            ],
        ),
        compiler_params=pltpu.CompilerParams(
            dimension_semantics=("parallel", "arbitrary"),
            vmem_limit_bytes=vmem_limit,
        ),
    )(x3, wt, b2)

    # Tiny epilogue reduce over the per-batch partial maxima (N*8*128 floats).
    return y32, y16, jnp.max(diff_part)


# -----------------------------------------------------------------------------
# WorkFlow: mirrors the orchestration structure of the PyTorch module.
# -----------------------------------------------------------------------------
class WorkFlow:
    def __init__(self, opts):
        self.opts = opts
        # TODO(synk): export_onnx / export_engine and the file logging of the
        # original WorkFlow are serialization steps with no Pallas equivalent.
        self.workflow = []
        for shape in opts["inference_shapes"]:
            for dtype in ("fp32", "fp16"):
                self.workflow.append(
                    ("infer_on_engine",
                     {"engine": "pallas-tpu", "dtype": dtype, "shape": shape}))
            self.workflow.append(("check_inference_result", {"shape": shape}))

    def forward(self, x_nchw, params):
        w, b = params
        # Both engine passes and the cross-engine check are fused into one
        # pallas_call (single pass over x in HBM).
        y32, y16, diff = run_workflow_fused(x_nchw, w, b)
        results = {}
        for idx, (func_name, func_args) in enumerate(self.workflow):
            if func_name == "infer_on_engine":
                key = f"{idx}:{func_name}:{func_args['dtype']}"
                results[key] = y32 if func_args["dtype"] == "fp32" else y16
            elif func_name == "check_inference_result":
                results[f"{idx}:{func_name}"] = diff
        return results

    __call__ = forward


if __name__ == "__main__":
    # Small shapes consistent with an NCHW image workflow.
    N, C, H, W = 2, 4, 16, 16
    COUT = 4

    key = jax.random.PRNGKey(0)
    kx, kw, kb = jax.random.split(key, 3)
    x = jax.random.normal(kx, (N, C, H, W), dtype=jnp.float32)
    w = jax.random.normal(kw, (C, COUT), dtype=jnp.float32) * 0.5
    b = jax.random.normal(kb, (COUT,), dtype=jnp.float32) * 0.1

    opts = {"inference_shapes": [(N, C, H, W)]}
    wf = WorkFlow(opts)
    results = wf(x, (w, b))
    results = jax.block_until_ready(results)

    vals = list(results.values())
    y32, y16, diff = vals[0], vals[1], vals[2]

    # Plain-JAX reference for the fp32 engine path.
    x3 = x.reshape(N, C, H * W)
    ref32 = jnp.maximum(
        jnp.einsum("oc,ncl->nol", w.T, x3) + b[None, :, None], 0.0)
    assert y32.shape == (N, COUT, H * W)
    assert y16.dtype == jnp.bfloat16
    assert jnp.max(jnp.abs(ref32 - y32)) < 1e-4
    # The fused in-kernel check must agree with recomputing it from outputs.
    recomputed = jnp.max(jnp.abs(y32 - y16.astype(jnp.float32)))
    assert jnp.abs(recomputed - diff) < 1e-6
    # bf16 engine should stay close to the fp32 engine.
    assert float(diff) < 0.25

    print("KERNEL_OK")
</pallas_src>

<mosaic_0001>
module attributes {stable_mosaic.version = 11 : i64} {
  func.func @_workflow_kernel(%arg0: i32, %arg1: i32, %arg2: memref<1x4x256xf32, #tpu.memory_space<vmem>>, %arg3: memref<4x4xf32, #tpu.memory_space<vmem>>, %arg4: memref<4x1xf32, #tpu.memory_space<vmem>>, %arg5: memref<1x4x256xf32, #tpu.memory_space<vmem>>, %arg6: memref<1x4x256xbf16, #tpu.memory_space<vmem>>, %arg7: memref<1x8x128xf32, #tpu.memory_space<vmem>>) attributes {dimension_semantics = [#tpu.dimension_semantics<parallel>, #tpu.dimension_semantics<arbitrary>], iteration_bounds = array<i64: 2, 1>, scalar_prefetch = 0 : i64, scratch_operands = 0 : i64, tpu.core_type = #tpu.core_type<tc>, window_params = [{transform_indices = @transform_0, window_bounds = array<i64: 1, 4, 256>}, {pipeline_mode = #tpu.pipeline_mode<synchronous>, transform_indices = @transform_1, window_bounds = array<i64: 4, 4>}, {pipeline_mode = #tpu.pipeline_mode<synchronous>, transform_indices = @transform_2, window_bounds = array<i64: 4, 1>}, {transform_indices = @transform_3, window_bounds = array<i64: 1, 4, 256>}, {transform_indices = @transform_4, window_bounds = array<i64: 1, 4, 256>}, {transform_indices = @transform_5, window_bounds = array<i64: 1, 8, 128>}]} {
    %c0 = arith.constant 0 : index
    %c0_0 = arith.constant 0 : index
    %c0_1 = arith.constant 0 : index
    %0 = vector.load %arg2[%c0, %c0_0, %c0_1] : memref<1x4x256xf32, #tpu.memory_space<vmem>>, vector<1x4x256xf32>
    %1 = vector.shape_cast %0 : vector<1x4x256xf32> to vector<4x256xf32>
    %c0_2 = arith.constant 0 : index
    %c0_3 = arith.constant 0 : index
    %2 = vector.load %arg3[%c0_2, %c0_3] : memref<4x4xf32, #tpu.memory_space<vmem>>, vector<4x4xf32>
    %c0_4 = arith.constant 0 : index
    %c0_5 = arith.constant 0 : index
    %3 = vector.load %arg4[%c0_4, %c0_5] : memref<4x1xf32, #tpu.memory_space<vmem>>, vector<4x1xf32>
    %cst = arith.constant dense<0.000000e+00> : vector<4x256xf32>
    %4 = tpu.matmul %2, %1, %cst {dimension_numbers = #tpu.dot_dimension_numbers<[1], [0], [0], [1], [0, 0, 1, 1], [], []>} : vector<4x4xf32>, vector<4x256xf32>, vector<4x256xf32> -> vector<4x256xf32>
    %5 = vector.broadcast %3 : vector<4x1xf32> to vector<4x256xf32>
    %6 = arith.addf %4, %5 : vector<4x256xf32>
    %cst_6 = arith.constant 0.000000e+00 : f32
    %7 = vector.broadcast %cst_6 : f32 to vector<4x256xf32>
    %8 = arith.maximumf %6, %7 : vector<4x256xf32>
    %c0_7 = arith.constant 0 : index
    %c0_8 = arith.constant 0 : index
    %c0_9 = arith.constant 0 : index
    %9 = vector.load %arg5[%c0_7, %c0_8, %c0_9] : memref<1x4x256xf32, #tpu.memory_space<vmem>>, vector<1x4x256xf32>
    %10 = vector.shape_cast %9 : vector<1x4x256xf32> to vector<4x256xf32>
    %11 = vector.shape_cast %8 : vector<4x256xf32> to vector<1x4x256xf32>
    tpu.vector_store %arg5[%c0_7, %c0_8, %c0_9], %11 {strides = array<i32>} : memref<1x4x256xf32, #tpu.memory_space<vmem>>, vector<1x4x256xf32>,
    %12 = arith.truncf %2 : vector<4x4xf32> to vector<4x4xbf16>
    %13 = arith.truncf %1 : vector<4x256xf32> to vector<4x256xbf16>
    %cst_10 = arith.constant dense<0.000000e+00> : vector<4x256xf32>
    %14 = tpu.matmul %12, %13, %cst_10 {dimension_numbers = #tpu.dot_dimension_numbers<[1], [0], [0], [1], [0, 0, 1, 1], [], []>} : vector<4x4xbf16>, vector<4x256xbf16>, vector<4x256xf32> -> vector<4x256xf32>
    %15 = vector.broadcast %3 : vector<4x1xf32> to vector<4x256xf32>
    %16 = arith.addf %14, %15 : vector<4x256xf32>
    %cst_11 = arith.constant 0.000000e+00 : f32
    %17 = vector.broadcast %cst_11 : f32 to vector<4x256xf32>
    %18 = arith.maximumf %16, %17 : vector<4x256xf32>
    %19 = arith.truncf %18 : vector<4x256xf32> to vector<4x256xbf16>
    %c0_12 = arith.constant 0 : index
    %c0_13 = arith.constant 0 : index
    %c0_14 = arith.constant 0 : index
    %20 = vector.load %arg6[%c0_12, %c0_13, %c0_14] : memref<1x4x256xbf16, #tpu.memory_space<vmem>>, vector<1x4x256xbf16>
    %21 = vector.shape_cast %20 : vector<1x4x256xbf16> to vector<4x256xbf16>
    %22 = vector.shape_cast %19 : vector<4x256xbf16> to vector<1x4x256xbf16>
    tpu.vector_store %arg6[%c0_12, %c0_13, %c0_14], %22 {strides = array<i32>} : memref<1x4x256xbf16, #tpu.memory_space<vmem>>, vector<1x4x256xbf16>,
    %c0_i32 = arith.constant 0 : i32
    %23 = arith.cmpi eq, %arg1, %c0_i32 : i32
    %24 = arith.extui %23 : i1 to i32
    %c0_i32_15 = arith.constant 0 : i32
    %25 = arith.cmpi ne, %24, %c0_i32_15 : i32
    scf.if %25 {
      %cst_23 = arith.constant 0.000000e+00 : f32
      %37 = vector.broadcast %cst_23 : f32 to vector<1x8x128xf32>
      %c0_24 = arith.constant 0 : index
      %c0_25 = arith.constant 0 : index
      %c0_26 = arith.constant 0 : index
      %38 = vector.load %arg7[%c0_24, %c0_25, %c0_26] : memref<1x8x128xf32, #tpu.memory_space<vmem>>, vector<1x8x128xf32>
      tpu.vector_store %arg7[%c0_24, %c0_25, %c0_26], %37 {strides = array<i32>} : memref<1x8x128xf32, #tpu.memory_space<vmem>>, vector<1x8x128xf32>,
    } else {
    }
    %26 = arith.extf %19 : vector<4x256xbf16> to vector<4x256xf32>
    %27 = arith.subf %8, %26 : vector<4x256xf32>
    %28 = math.absf %27 : vector<4x256xf32>
    %29 = vector.shape_cast %28 : vector<4x256xf32> to vector<1x4x256xf32>
    %cst_16 = arith.constant dense<0xFF800000> : vector<1xf32>
    %30 = vector.multi_reduction <maximumf>, %29, %cst_16 [1, 2] : vector<1x4x256xf32> to vector<1xf32>
    %31 = vector.shape_cast %30 : vector<1xf32> to vector<1x1x1xf32>
    %32 = vector.extract %31[0, 0, 0] : f32 from vector<1x1x1xf32>
    %c0_17 = arith.constant 0 : index
    %c0_18 = arith.constant 0 : index
    %c0_19 = arith.constant 0 : index
    %33 = vector.load %arg7[%c0_17, %c0_18, %c0_19] : memref<1x8x128xf32, #tpu.memory_space<vmem>>, vector<1x8x128xf32>
    %34 = vector.broadcast %32 : f32 to vector<1x8x128xf32>
    %35 = arith.maximumf %33, %34 : vector<1x8x128xf32>
    %c0_20 = arith.constant 0 : index
    %c0_21 = arith.constant 0 : index
    %c0_22 = arith.constant 0 : index
    %36 = vector.load %arg7[%c0_20, %c0_21, %c0_22] : memref<1x8x128xf32, #tpu.memory_space<vmem>>, vector<1x8x128xf32>
    tpu.vector_store %arg7[%c0_20, %c0_21, %c0_22], %35 {strides = array<i32>} : memref<1x8x128xf32, #tpu.memory_space<vmem>>, vector<1x8x128xf32>,
    return
  }
  func.func @transform_0(%arg0: i32, %arg1: i32) -> (i32, i32, i32) {
    %c0_i32 = arith.constant 0 : i32
    %c0_i32_0 = arith.constant 0 : i32
    return %arg0, %c0_i32, %arg1 : i32, i32, i32
  }
  func.func @transform_1(%arg0: i32, %arg1: i32) -> (i32, i32) {
    %c0_i32 = arith.constant 0 : i32
    %c0_i32_0 = arith.constant 0 : i32
    %c0_i32_1 = arith.constant 0 : i32
    return %c0_i32, %c0_i32_0 : i32, i32
  }
  func.func @transform_2(%arg0: i32, %arg1: i32) -> (i32, i32) {
    %c0_i32 = arith.constant 0 : i32
    %c0_i32_0 = arith.constant 0 : i32
    %c0_i32_1 = arith.constant 0 : i32
    return %c0_i32, %c0_i32_0 : i32, i32
  }
  func.func @transform_3(%arg0: i32, %arg1: i32) -> (i32, i32, i32) {
    %c0_i32 = arith.constant 0 : i32
    %c0_i32_0 = arith.constant 0 : i32
    return %arg0, %c0_i32, %arg1 : i32, i32, i32
  }
  func.func @transform_4(%arg0: i32, %arg1: i32) -> (i32, i32, i32) {
    %c0_i32 = arith.constant 0 : i32
    %c0_i32_0 = arith.constant 0 : i32
    return %arg0, %c0_i32, %arg1 : i32, i32, i32
  }
  func.func @transform_5(%arg0: i32, %arg1: i32) -> (i32, i32, i32) {
    %c0_i32 = arith.constant 0 : i32
    %c0_i32_0 = arith.constant 0 : i32
    %c0_i32_1 = arith.constant 0 : i32
    return %arg0, %c0_i32, %c0_i32_0 : i32, i32, i32
  }
}

</mosaic_0001>

<bundles_post_ra>
// kernel: tpu_custom_call.1
= control target key start
LH: loop header
LB: loop body
LE: loop exit
PB: predicated region body
PF: predicated region fallthrough
CT: control target
= control target key end

     0   :  { %s1150_s0 = inlined_call_operand.hbm [shape: f32[2,4,256], index: 0, kind: input, shape index: {}]   ;;  %s1151_s1 = inlined_call_operand.vmem [shape: f32[4,4], index: 1, kind: input, shape index: {}]   ;;  %s1152_s2 = inlined_call_operand.vmem [shape: f32[4,1], index: 2, kind: input, shape index: {}]   ;;  %s1153_s3 = inlined_call_operand.hbm [shape: f32[2,4,256], index: 3, kind: output, shape index: {0}]   ;;  %s1154_s4 = inlined_call_operand.hbm [shape: bf16[2,4,256], index: 4, kind: output, shape index: {1}]   ;;  %s1155_s5 = inlined_call_operand.hbm [shape: f32[2,8,128], index: 5, kind: output, shape index: {2}]  }
   0x1   :  { %1158 = sst [smem:[#allocation12_spill]] %s1150_s0 }
   0x2   :  { %1159 = sst [smem:[#allocation13_spill]] %s1151_s1 }
   0x3   :  { %1160 = sst [smem:[#allocation14_spill]] %s1152_s2 }
   0x4   :  { %11 = vsyncpa [#allocation3], 0 }
   0x5   :  { %13 = vsyncpa [#allocation3 + $0x1], 0 }
   0x6   :  { %14 = vsyncpa [#allocation4], 0 }
   0x7   :  { %16 = vsyncpa [#allocation4 + $0x1], 0 }
   0x8   :  { %17 = vsyncpa [#allocation7], 0 }
   0x9   :  { %19 = vsyncpa [#allocation7 + $0x1], 0  ;;  %s958_s18 = smov 0   ;;  %s960_s19 = smov 0  }
   0xa   :  { %s962_s20 = smov 0   ;;  %s964_s21 = smov 0  }
   0xb   :  { %s966_s22 = smov 0   ;;  %s968_s23 = smov 0  }
   0xc LB: > { %s989_s24 = sadd.s32 4294967295, %s925_s23   ;;  %s1156_s25 = sadd.s32 4294967294, %s925_s23   ;;  %s925_s23 = sphi %s968_s23, %s25_s23   ;;  %s921_s22 = sphi %s966_s22, %s1174_s22   ;;  %s917_s21 = sphi %s964_s21, %s1173_s21   ;;  %s913_s20 = sphi %s962_s20, %s1172_s20   ;;  %s909_s19 = sphi %s960_s19, %s1171_s19   ;;  %s905_s18 = sphi %s958_s18, %s1170_s18  }
   0xd   : > { %s37_s26 = sadd.s32 1, %s921_s22  ;;  %s46_s27 = sadd.s32 1, %s913_s20 }
   0xe   : > { %p39_p0 = scmp.ge.s32.totalorder %s37_s26, 2  ;;  %p53_p1 = scmp.ne.s32.totalorder %s913_s20, %s909_s19 }
   0xf   : > { %p54_p2 = scmp.eq.s32.totalorder %s925_s23, 0  ;;  %p59_p3 = scmp.ne.s32.totalorder %s909_s19, %s905_s18 }
  0x10   : > { %s1176_s26 = smov (%p39_p0, %s37_s26), 0  ;;  %p60_p5 = scmp.eq.s32.totalorder %s989_s24, 0 }
  0x11   : > { %p1001_p4 = por %p54_p2, %p53_p1  ;;  %s41_s29 = ssub.s32 %s921_s22, %s1176_s26 }
  0x12   : > { %p127_p6 = scmp.eq.s32.totalorder %s989_s24, 1  ;;  %p44_p7 = scmp.eq.s32.totalorder %s41_s29, 0 }
  0x13   : > { %p1009_p8 = por %p60_p5, %p59_p3  ;;  %p133_p10 = scmp.eq.s32.totalorder %s1156_s25, 1 }
  0x14   : > { %p1013_p9 = por %p127_p6, %p53_p1  ;;  %p648_p12 = scmp.ge.s32.totalorder %s925_s23, 2 }
  0x15   : > { %s1020_s7 = scalar_select %p44_p7, %s913_s20, %s46_s27  }
  0x16   : > { %p1022_p11 = por %p133_p10, %p59_p3  ;;  %p700_p13 = scmp.lt.s32.totalorder %s925_s23, 2 }
  0x17   : > { %s213_s9 = sand.u32 1, %s913_s20   ;;  %s673_s11 = sshll.u32 %s921_s22, 3 }
  0x18   : > { %s649_s10 = sshll.u32 %s213_s9, 3  ;;  %s1165_s0 = sld [smem:[#allocation12_spill]] }
  0x19   : > { %s217_s15 = scalar_lea.vmem [#allocation2], %s649_s10  ;;  %p687_p0 = pnand %p700_p13, %p1001_p4 }
  0x1a   : > { %s228_s16 = sshll.u32 %s217_s15, 4  ;;  %p652_p1 = scmp.ge.s32.totalorder %s925_s23, 1  ;;  %s229_s16 = int_to_ptr.vmem [resolvable:$true] %s228_s16 }
  0x1b   : > { %p233_p2 = scmp.lt.s32.totalorder %s925_s23, 3  ;;  %s214_s27 = scalar_lea.sflag [#allocation3], %s213_s9 }
  0x1d   : > { %p234_p3 = pnand %p652_p1, %p233_p2 }
  0x1e   : > { %s224_s14 = scalar_lea.hbm %s1165_s0, %s673_s11  ;;  %s1038_s29 = sand.u32 (!%p234_p3), 1, %s909_s19  }
  0x1f   : > { %s226_s17 = sshll.u32 %s224_s14, 4  ;;  %237 = sbr.rel (%p234_p3) target bundleno = 391 (0x187), region = 32  ;;  %s227_s17 = int_to_ptr.hbm [resolvable:$true] %s226_s17 }
  0x20   : > { %689 = dma.hbm_to_vmem [thread:$0]  (!%p687_p0), %s227_s17, 128, %s229_s16, %s214_s27  }
  0x21   : > { %s1041_s11 = sshll.u32 (!%p234_p3), %s1038_s29, 3  ;;  %s240_s10 = scalar_lea.sflag (!%p234_p3), [#allocation3], %s1038_s29 }
  0x22   : > { %s243_s12 = scalar_lea.vmem (!%p234_p3), [#allocation2], %s1041_s11 }
  0x24   : > { %892 = dma.done.wait (%p1009_p8), %s240_s10, 128  }
  0x25   : > { %894 = vsyncadd (%p1009_p8), %s240_s10, 4294967168  ;;  %v927_v0 = vmov 0   ;;  %v285_v1 = vld [vmem:[%s243_s12] sm:$0xff]  ;;  %s1166_s2 = sld [smem:[#allocation14_spill]]  ;;  %vm301_vm0 = vcmask 1043456   ;;  %vm297_vm1 = vcmask 31744  }
  0x26   : > { %752 = vset.pattern.permute.xlu0 %v927_v0  ;;  %294 = vst [vmem:[#allocation1] ss:$2 sm:$0xff] %v285_v1  ;;  %s1167_s1 = sld [smem:[#allocation13_spill]]  ;;  %vm365_vm2 = vcmask 1041408   ;;  %s1157_s30 = scalar_lea.vmem [#allocation5], %s1041_s11 }
  0x27   : > { %s655_s15 = sshll.u32 %s1038_s29, 2  ;;  %s675_s17 = sshll.u32 %s917_s21, 2 }
  0x28   : > { %s273_s16 = scalar_lea.vmem [#allocation6], %s655_s15  ;;  %s476_s12 = scalar_lea.hbm %s1154_s4, %s675_s17 }
  0x29   : > { %s674_s28 = sshll.u32 %s917_s21, 3  ;;  %s440_s9 = sand.u32 1, %s989_s24  }
  0x2a   : > { %s478_s13 = sshll.u32 %s273_s16, 4  ;;  %s480_s14 = sshll.u32 %s476_s12, 4  ;;  %s479_s13 = int_to_ptr.vmem [resolvable:$true] %s478_s13  ;;  %s481_s14 = int_to_ptr.hbm [resolvable:$true] %s480_s14 }
  0x2b   : > { %v287_v2 = vld [vmem:[%s1166_s2] sm:$0xf]  ;;  %s1082_s0 = scalar_lea.sflag [#allocation7], %s440_s9 }
  0x2c   : > { %290 = vperm.xlu0 %752, %v287_v2   ;;  %v286_v5 = vld [vmem:[%s1167_s1] sm:$0xf]  ;;  %s797_s1 = sshra.s32 %s481_s14, 4  ;;  %s798_s1 = int_to_ptr.hbm [resolvable:$true] %s797_s1 }
  0x2d   : > { %v295_v3 = vld.sshfl [vmem:[#allocation1] sm:$0xff pattern:$0x75316420]  ;;  %v296_v4 = vld.sshfl [vmem:[#allocation1 + $0x8] sm:$0xff pattern:$0x75316420]  ;;  %v354_v12 = vpack.c.bf16 %v286_v5, %v286_v5  ;;  %p804_p7 = scmp.lt.s32.totalorder %s798_s1, %s1154_s4 }
  0x2e   : > { %355 = vst [vmem:[#allocation1] ss:$2 sm:$0xff] %v285_v1  ;;  %659 = vmatpush.msk.msra.mxu1 %vm301_vm0, %v296_v4  ;;  %657 = vmatpush.msk.msra.mxu0 %vm301_vm0, %v295_v3  ;;  %s799_s2 = scalar_lea.hbm %s798_s1, 4 }
  0x2f   : > { %660 = vmatmul.msk.f32.vlgmr.msra.gmra.mxu1 %vm297_vm1, %v286_v5  ;;  %658 = vmatmul.msk.f32.vlgmr.msra.gmra.mxu0 %vm297_vm1, %v286_v5  ;;  %p800_p4 = scmp.ne.s32.totalorder %s798_s1, %s799_s2 }
  0x31   : > { %p801_p5 = pnand %p800_p4, %p1013_p9 }
  0x33   : > { %p802_p6 = pneg %p801_p5 }
  0x35   : > { %v356_v6 = vld.sshfl [vmem:[#allocation1] sm:$0xff pattern:$0x75316420]  ;;  %v357_v7 = vld.sshfl [vmem:[#allocation1 + $0x8] sm:$0xff pattern:$0x75316420] }
  0x36   : > { %v360_v8 = vpack.c.bf16 %v356_v6, %v356_v6  ;;  %v361_v9 = vpack.c.bf16 %v357_v7, %v357_v7 }
  0x38   : > { %v367_v10 = vsel %vm365_vm2, %v360_v8, 0  ;;  %v370_v11 = vsel %vm365_vm2, %v361_v9, 0 }
  0x39   : > { %379 = vmatpush.bf16.msra.mxu2 %v367_v10  ;;  %392 = vmatpush.bf16.msra.mxu3 %v370_v11 }
  0x3c   : > { %661 = vmatmul.msk.bf16.vlgmr.msra.gmra.mxu2 %vm297_vm1, %v354_v12  ;;  %662 = vmatmul.msk.bf16.vlgmr.msra.gmra.mxu3 %vm297_vm1, %v354_v12 }
  0x9e   : > { %v291_v13 = vpop.permute.xlu0 %290 }
  0xac   : > { %v343_v14 = vpop.f32.mrf.mxu1  ;;  %v323_v15 = vpop.f32.mrf.mxu0 }
  0xad   : > { %v344_v16 = vadd.f32 %v343_v14, %v291_v13  ;;  %v324_v17 = vadd.f32 %v323_v15, %v291_v13 }
  0xaf   : > { %v347_v18 = vmax.f32 %v344_v16, 0.0  ;;  %v346_v19 = vmax.f32 %v324_v17, 0.0 }
  0xb1   : > { %v350_v20 = vrot.slane %v347_v18, 4 }
  0xb3   : > { %v351_v21 = vsel %vm301_vm0, %v346_v19, %v350_v20 }
  0xb4   : > { %353 = vst [vmem:[%s1157_s30] sm:$0xff] %v351_v21  ;;  %s459_s30 = scalar_lea.hbm %s1153_s3, %s674_s28 }
  0xbf   : > { %v381_v22 = vpop.f32.mrf.mxu2  ;;  %v394_v23 = vpop.f32.mrf.mxu3 }
  0xc0   : > { %v382_v24 = vadd.f32 %v381_v22, %v291_v13  ;;  %v395_v25 = vadd.f32 %v394_v23, %v291_v13 }
  0xc2   : > { %v398_v26 = vmax.f32 %v382_v24, 0.0  ;;  %v399_v27 = vmax.f32 %v395_v25, 0.0 }
  0xc4   : > { %v400_v28 = vpack.c.bf16 %v399_v27, %v398_v26 }
  0xc6   : > { %v402_v29 = vrot.slane %v400_v28, 2  ;;  %v413_v30 = vunpack.c.l.bf16 %v400_v28  ;;  %v414_v31 = vunpack.c.h.bf16 %v400_v28 }
  0xc7   : > { %v383_v32 = vpop.f32.mrf.mxu2  ;;  %v396_v33 = vpop.f32.mrf.mxu3 }
  0xc8   : > { %v415_v34 = vsub.f32 %v346_v19, %v413_v30  ;;  %v416_v35 = vsub.f32 %v347_v18, %v414_v31  ;;  %v405_v36 = vsel %vm365_vm2, %v400_v28, %v402_v29 }
  0xc9   : > { %407 = vst [vmem:[%s273_s16] sm:$0xf] %v405_v36  ;;  %s803_s16 = scalar_lea.hbm %s1154_s4, 8 }
  0xca   : > { %v417_v37 = vand.u32 2147483647, %v415_v34  ;;  %v418_v38 = vand.u32 2147483647, %v416_v35  ;;  %p805_p8 = scmp.lt.s32.totalorder %s803_s16, %s799_s2 }
  0xcc   : > { %v419_v39 = vsel %vm301_vm0, %v417_v37, -inf  ;;  %v420_v40 = vsel %vm301_vm0, %v418_v38, -inf  ;;  %p806_p10 = por %p805_p8, %p804_p7 }
  0xcd   : > { %v421_v41 = vmax.f32 %v419_v39, %v420_v40 }
  0xce   : > { %p807_p13 = pnand %p806_p10, %p802_p6 }
  0xcf   : > { %422 = vmax.xlane.f32.xlu0 %v421_v41 }
  0xd0   : > { %810 = shalt.err (!%p807_p13)
}
  0xd1   : > { %681 = dma.vmem_to_hbm [thread:$0]  (%p1013_p9), %s479_s13, 64, %s481_s14, %s1082_s0  }
  0xd2   : > { %s1168_s25 = scalar_lea.vmem [#allocation5], %s1041_s11  ;;  %s463_s9 = sshll.u32 %s459_s30, 4  ;;  %s464_s9 = int_to_ptr.hbm [resolvable:$true] %s463_s9 }
  0xd3   : > { %s461_s12 = sshll.u32 %s1168_s25, 4  ;;  %s436_s15 = scalar_lea.sflag [#allocation4], %s1038_s29  ;;  %s462_s12 = int_to_ptr.vmem [resolvable:$true] %s461_s12 }
  0xd4   : > { %s825_s17 = sshra.s32 %s464_s9, 4  ;;  %s831_s16 = scalar_lea.hbm %s1153_s3, 16  ;;  %s826_s17 = int_to_ptr.hbm [resolvable:$true] %s825_s17 }
  0xd5   : > { %s827_s1 = scalar_lea.hbm %s826_s17, 8  ;;  %p832_p3 = scmp.lt.s32.totalorder %s826_s17, %s1153_s3 }
  0xd6   : > { %p828_p0 = scmp.ne.s32.totalorder %s826_s17, %s827_s1  ;;  %p833_p4 = scmp.lt.s32.totalorder %s831_s16, %s827_s1 }
  0xd8   : > { %p829_p1 = pnand %p828_p0, %p1013_p9  ;;  %p834_p5 = por %p833_p4, %p832_p3 }
  0xda   : > { %p830_p2 = pneg %p829_p1 }
  0xdc   : > { %p835_p6 = pnand %p834_p5, %p830_p2 }
  0xde   : > { %838 = shalt.err (!%p835_p6)
}
  0xdf   : > { %680 = dma.vmem_to_hbm [thread:$0]  (%p1013_p9), %s462_s12, 128, %s464_s9, %s436_s15  }
  0xe0   : > { %s490_s13 = scalar_lea.hbm %s1155_s5, %s674_s28  ;;  %s280_s25 = scalar_lea.vmem [#allocation8], %s1041_s11 }
  0xe1   : > { %s494_s14 = sshll.u32 %s490_s13, 4  ;;  %s492_s17 = sshll.u32 %s280_s25, 4  ;;  %s493_s17 = int_to_ptr.vmem [resolvable:$true] %s492_s17  ;;  %s495_s14 = int_to_ptr.hbm [resolvable:$true] %s494_s14 }
  0xe2   : > { %s853_s12 = sshra.s32 %s495_s14, 4  ;;  %s859_s28 = scalar_lea.hbm %s1155_s5, 16  ;;  %s854_s12 = int_to_ptr.hbm [resolvable:$true] %s853_s12 }
  0xe3   : > { %s855_s9 = scalar_lea.hbm %s854_s12, 8  ;;  %p860_p13 = scmp.lt.s32.totalorder %s854_s12, %s1155_s5 }
  0xe4   : > { %p856_p7 = scmp.ne.s32.totalorder %s854_s12, %s855_s9  ;;  %p861_p0 = scmp.lt.s32.totalorder %s859_s28, %s855_s9 }
  0xe6   : > { %p857_p8 = pnand %p856_p7, %p1013_p9  ;;  %p862_p1 = por %p861_p0, %p860_p13 }
  0xe8   : > { %p858_p10 = pneg %p857_p8 }
  0xea   : > { %p863_p2 = pnand %p862_p1, %p858_p10 }
 0x142   : > { %v423_v42 = vpop.xlane.xlu0 %422 }
 0x143   : > { %v424_v43 = vrot.slane %v423_v42, 4 }
 0x145   : > { %v425_v44 = vmax.f32 %v423_v42, %v424_v43 }
 0x147   : > { %v426_v45 = vrot.slane %v425_v44, 2 }
 0x149   : > { %v427_v46 = vmax.f32 %v425_v44, %v426_v45 }
 0x14b   : > { %v428_v47 = vrot.slane %v427_v46, 1 }
 0x14d   : > { %v429_v48 = vmax.f32 %v427_v46, %v428_v47 }
 0x14f   : > { %676 = vpush %v429_v48 }
 0x180   : > { %s677_s1 = spop %676 }
 0x181   : > { %v432_v49 = vstv %s677_s1 }
 0x182   : > { %v433_v50 = vmax.f32 %v432_v49, 0.0 }
 0x184   : > { %434 = vst [vmem:[%s280_s25] sm:$0xff] %v433_v50 }
 0x185   : > { %866 = shalt.err (!%p863_p2)
}
 0x186   : > { %682 = dma.vmem_to_hbm [thread:$0]  (%p1013_p9), %s493_s17, 128, %s495_s14, %s1082_s0  }
 0x187 PF: > { %s506_s24 = sand.u32 1, %s905_s18   ;;  %p691_p3 = pnand %p648_p12, %p1022_p11 }
 0x188   : > { %s507_s16 = scalar_lea.sflag [#allocation4], %s506_s24 }
 0x189   : > { %p692_p4 = pneg %p691_p3 }
 0x18b   : > { %896 = dma.done.wait (%p692_p4), %s507_s16, 128  }
 0x18c   : > { %898 = vsyncadd (%p692_p4), %s507_s16, 4294967168  ;;  %s1169_s27 = sadd.s32 4294967294, %s925_s23  }
 0x18d   : > { %s516_s10 = sand.u32 1, %s1169_s27  }
 0x18e   : > { %s517_s29 = scalar_lea.sflag [#allocation7], %s516_s10 }
 0x18f   : > { %900 = dma.done.wait (%p692_p4), %s517_s29, 192  }
 0x190   : > { %902 = vsyncadd (%p692_p4), %s517_s29, 4294967104  ;;  %s25_s23 = sadd.s32 1, %s925_s23   ;;  %s1170_s18 = smov %s909_s19 }
 0x191   : > { %p22_p9 = scmp.ge.s32.totalorder %s25_s23, 4   ;;  %s1171_s19 = smov %s913_s20 }
 0x192   : > { %s1172_s20 = smov %s1020_s7  ;;  %s1173_s21 = smov %s921_s22 }
 0x193   : > { %s1174_s22 = smov %s1176_s26  ;;  %24 = sbr.rel (!%p22_p9) target bundleno = 12 (0xc), region = 113 }
 0x198   :  { %533 = vsyncpa [#allocation3], 1 }
 0x199   :  { %535 = vsyncpa [#allocation3 + $0x1], 1 }
 0x19a   :  { %536 = vsyncpa [#allocation4], 1 }
 0x19b   :  { %538 = vsyncpa [#allocation4 + $0x1], 1 }
 0x19c   :  { %539 = vsyncpa [#allocation7], 1 }
 0x19d   :  { %541 = vsyncpa [#allocation7 + $0x1], 1 }

</bundles_post_ra>
